<compile_context>
chip_gen: v5e
topology: v5e:2x2
jax: 0.10.0
libtpu: 0.0.40
codegen_flags: <defaults>
</compile_context>

<pallas_src>
import functools

import jax
import jax.numpy as jnp
import numpy as np
from jax.experimental import pallas as pl
from jax.experimental.pallas import tpu as pltpu


def _deconv_phase_gemm_kernel(p_ref, w_ref, b_ref, a_ref, o_ref):
    """GEMM + bias + PReLU on one tile of rows.

    p_ref: (tile_m, 4*C_in)   bf16   (phase/im2col patches)
    w_ref: (4*C_in, 4*C_out)  bf16   (resident weight)
    b_ref: (1, 4*C_out)       f32    (resident bias, tiled over phases)
    a_ref: (1,)               f32    SMEM scalar (PReLU slope)
    o_ref: (tile_m, 4*C_out)  bf16
    """
    acc = jnp.dot(p_ref[...], w_ref[...], preferred_element_type=jnp.float32)
    acc = acc + b_ref[...]                      # f32 bias add
    alpha = a_ref[0]
    act = jnp.where(acc > 0, acc, alpha * acc)  # f32 PReLU
    o_ref[...] = act.astype(o_ref.dtype)        # cast only at the store


def _round_up(x, m):
    return (x + m - 1) // m * m


@functools.partial(jax.jit, static_argnames=("tile_m", "out_nchw", "out_dtype"))
def deconv_block_forward(x, weight, bias, prelu_alpha, *, tile_m=8192,
                         out_nchw=True, out_dtype=jnp.float32):
    """Forward of DeconvBlock(norm=None, activation='prelu') for k=4,s=2,p=1.

    x:      (N, C_in, H, W)        float32, NCHW (PyTorch convention)
    weight: (C_in, C_out, 4, 4)    PyTorch ConvTranspose2d layout
    bias:   (C_out,)
    prelu_alpha: scalar (PReLU with num_parameters=1)
    returns (N, C_out, 2H, 2W) in `out_dtype` (NCHW) if out_nchw else NHWC.
    """
    N, C_in, H, W = x.shape
    _, C_out, kH, kW = weight.shape
    assert (kH, kW) == (4, 4), "phase decomposition is specific to k=4,s=2,p=1"
    Ho, Wo = 2 * H, 2 * W

    # ---------------- glue (plain JAX): phase im2col, all in bf16 ----------------
    # Output pixel oy = 2*my - 1 + qy (qy in {0,1}) depends on input rows
    # {my-1, my} with taps ky = 2 + qy - 2*dy (dy in {0,1}); same for x-dim.
    # Every coarse position (my, mx) in [0,H] x [0,W] needs one 2x2 window of
    # the 1-padded input and produces all 4 output phases at once.
    x_nhwc = jnp.transpose(x, (0, 2, 3, 1)).astype(jnp.bfloat16)  # (N,H,W,Cin) bf16
    xp = jnp.pad(x_nhwc, ((0, 0), (1, 1), (1, 1), (0, 0)))        # (N,H+2,W+2,Cin)

    Hc, Wc = H + 1, W + 1
    p00 = xp[:, 0:Hc,     0:Wc,     :]
    p01 = xp[:, 0:Hc,     1:Wc + 1, :]
    p10 = xp[:, 1:Hc + 1, 0:Wc,     :]
    p11 = xp[:, 1:Hc + 1, 1:Wc + 1, :]
    # columns ordered (dy, dx, ci)
    patches = jnp.concatenate([p00, p01, p10, p11], axis=-1)      # (N,Hc,Wc,4Cin) bf16

    Kdim = 4 * C_in
    Ncol = 4 * C_out
    M = N * Hc * Wc
    patches = patches.reshape(M, Kdim)

    # Equivalent per-phase 2x2 weights:
    #   w_mat[(dy,dx,ci), (qy,qx,co)] = weight[ci, co, 2+qy-2*dy, 2+qx-2*dx]
    d = np.arange(2)
    q = np.arange(2)
    k_idx = 2 + q[None, :] - 2 * d[:, None]                       # [[2,3],[0,1]]
    w_t = jnp.transpose(weight, (2, 3, 0, 1))                     # (kH,kW,Cin,Cout)
    w_g = w_t[k_idx][:, :, k_idx]                                 # (dy,qy,dx,qx,Cin,Cout)
    w_mat = jnp.transpose(w_g, (0, 2, 4, 1, 3, 5)).reshape(Kdim, Ncol)
    w_bf = w_mat.astype(jnp.bfloat16)

    # bias tiled over the 4 phases, column order (qy, qx, co); f32 in-kernel
    b_cols = jnp.tile(bias.astype(jnp.float32), 4).reshape(1, Ncol)
    a_smem = jnp.asarray(prelu_alpha, jnp.float32).reshape(1,)

    # ---------------- tile selection ----------------
    # VMEM per step (double-buffered): bf16 patches tile + bf16 output tile,
    # plus the resident weight/bias.  This is tiny for typical channel counts,
    # so tile_m is mostly bounded by (a) the 8192 default and (b) splitting M
    # into >=2 blocks so both v7x TensorCores get a share of the "parallel" axis.
    bytes_per_row = Kdim * 2 + Ncol * 2
    resident_bytes = 2 * Kdim * Ncol * 2 + 2 * Ncol * 4
    budget = 40 * 1024 * 1024
    max_rows = max(512, (budget - resident_bytes) // (2 * bytes_per_row))
    tile_m_eff = min(int(tile_m), int(max_rows))
    tile_m_eff = min(tile_m_eff, _round_up(-(-M // 2), 512))      # >=2 grid blocks
    tile_m_eff = max(512, tile_m_eff // 512 * 512)                # 512-aligned (bf16-safe)

    M_pad = _round_up(M, tile_m_eff)
    if M_pad != M:
        # Fuses into the XLA patch-build fusion; pad rows are cropped later.
        patches = jnp.pad(patches, ((0, M_pad - M), (0, 0)))
    grid = (M_pad // tile_m_eff,)

    blk_bytes = (2 * tile_m_eff * Kdim * 2     # patches tiles (bf16, dbl-buffered)
                 + 2 * tile_m_eff * Ncol * 2   # output tiles (bf16, dbl-buffered)
                 + resident_bytes)             # weight + bias
    vmem_limit = int(min(60 * 1024 * 1024,
                         max(32 * 1024 * 1024, blk_bytes + (4 << 20))))

    # ---------------- hot path: GEMM + bias + PReLU in Pallas ----------------
    out = pl.pallas_call(
        _deconv_phase_gemm_kernel,
        out_shape=jax.ShapeDtypeStruct((M_pad, Ncol), jnp.bfloat16),
        grid_spec=pltpu.PrefetchScalarGridSpec(
            num_scalar_prefetch=0,
            grid=grid,
            in_specs=[
                pl.BlockSpec((tile_m_eff, Kdim), lambda i: (i, 0)),
                pl.BlockSpec((Kdim, Ncol), lambda i: (0, 0)),
                pl.BlockSpec((1, Ncol), lambda i: (0, 0)),
                pl.BlockSpec(memory_space=pltpu.MemorySpace.SMEM),
            ],
            out_specs=pl.BlockSpec((tile_m_eff, Ncol), lambda i: (i, 0)),
        ),
        compiler_params=pltpu.CompilerParams(
            dimension_semantics=("parallel",),
            vmem_limit_bytes=vmem_limit,
        ),
    )(patches, w_bf, b_cols, a_smem)

    # ---------------- pixel shuffle + crop (bf16), final cast fused ----------------
    out = out[:M].reshape(N, Hc, Wc, 2, 2, C_out)                 # (n,my,mx,qy,qx,co)
    out = jnp.transpose(out, (0, 1, 3, 2, 4, 5)).reshape(N, 2 * Hc, 2 * Wc, C_out)
    out = out[:, 1:1 + Ho, 1:1 + Wo, :]                           # drop oy=-1 / oy=2H
    if out_nchw:
        out = jnp.transpose(out, (0, 3, 1, 2))
    return out.astype(out_dtype)


if __name__ == "__main__":
    key = jax.random.PRNGKey(0)
    k_x, k_w, k_b = jax.random.split(key, 3)

    # small but lane-dense shapes: K = 4*C_in = 128, GEMM cols = 4*C_out = 128
    N, C_in, H, W = 2, 32, 16, 16
    C_out, K = 32, 4

    x = jax.random.normal(k_x, (N, C_in, H, W), jnp.float32)
    fan_in = C_out * K * K
    bound = 1.0 / float(np.sqrt(fan_in))
    weight = jax.random.uniform(k_w, (C_in, C_out, K, K), jnp.float32, -bound, bound)
    bias = jax.random.uniform(k_b, (C_out,), jnp.float32, -bound, bound)
    prelu_alpha = jnp.float32(0.25)               # torch.nn.PReLU() default init

    y = deconv_block_forward(x, weight, bias, prelu_alpha)
    y = jax.block_until_ready(y)
    assert y.shape == (N, C_out, 2 * H, 2 * W)
    assert y.dtype == jnp.float32

    # independent reference (transposed conv via lhs-dilated regular conv), f32
    wf_ref = jnp.transpose(weight, (1, 0, 2, 3))[:, :, ::-1, ::-1]  # OIHW, flipped
    ref = jax.lax.conv_general_dilated(
        x, wf_ref, window_strides=(1, 1),
        padding=[(K - 1 - 1, K - 1 - 1)] * 2, lhs_dilation=(2, 2),
        dimension_numbers=("NCHW", "OIHW", "NCHW"))
    ref = ref + bias[None, :, None, None]
    ref = jnp.where(ref > 0, ref, 0.25 * ref)

    # bf16 operands + bf16 stores with f32 accumulation -> loosened tolerance
    np.testing.assert_allclose(np.asarray(y), np.asarray(ref), rtol=2e-2, atol=2e-2)

    print("KERNEL_OK")
</pallas_src>

<mosaic_0001>
module attributes {stable_mosaic.version = 11 : i64} {
  func.func @_deconv_phase_gemm_kernel(%arg0: i32, %arg1: memref<512x128xbf16, #tpu.memory_space<vmem>>, %arg2: memref<128x128xbf16, #tpu.memory_space<vmem>>, %arg3: memref<1x128xf32, #tpu.memory_space<vmem>>, %arg4: memref<1xf32, #tpu.memory_space<smem>>, %arg5: memref<512x128xbf16, #tpu.memory_space<vmem>>) attributes {dimension_semantics = [#tpu.dimension_semantics<parallel>], iteration_bounds = array<i64: 2>, scalar_prefetch = 0 : i64, scratch_operands = 0 : i64, tpu.core_type = #tpu.core_type<tc>, window_params = [{transform_indices = @transform_0, window_bounds = array<i64: 512, 128>}, {pipeline_mode = #tpu.pipeline_mode<synchronous>, transform_indices = @transform_1, window_bounds = array<i64: 128, 128>}, {pipeline_mode = #tpu.pipeline_mode<synchronous>, transform_indices = @transform_2, window_bounds = array<i64: 1, 128>}, {transform_indices = @transform_3, window_bounds = array<i64: 1>}, {transform_indices = @transform_4, window_bounds = array<i64: 512, 128>}]} {
    %c0 = arith.constant 0 : index
    %c0_0 = arith.constant 0 : index
    %0 = vector.load %arg1[%c0, %c0_0] : memref<512x128xbf16, #tpu.memory_space<vmem>>, vector<512x128xbf16>
    %c0_1 = arith.constant 0 : index
    %c0_2 = arith.constant 0 : index
    %1 = vector.load %arg2[%c0_1, %c0_2] : memref<128x128xbf16, #tpu.memory_space<vmem>>, vector<128x128xbf16>
    %cst = arith.constant dense<0.000000e+00> : vector<512x128xf32>
    %2 = tpu.matmul %0, %1, %cst {dimension_numbers = #tpu.dot_dimension_numbers<[1], [0], [0], [1], [0, 0, 1, 1], [], []>} : vector<512x128xbf16>, vector<128x128xbf16>, vector<512x128xf32> -> vector<512x128xf32>
    %c0_3 = arith.constant 0 : index
    %c0_4 = arith.constant 0 : index
    %3 = vector.load %arg3[%c0_3, %c0_4] : memref<1x128xf32, #tpu.memory_space<vmem>>, vector<1x128xf32>
    %4 = vector.broadcast %3 : vector<1x128xf32> to vector<512x128xf32>
    %5 = arith.addf %2, %4 : vector<512x128xf32>
    %c0_5 = arith.constant 0 : index
    %6 = memref.load %arg4[%c0_5] : memref<1xf32, #tpu.memory_space<smem>>
    %cst_6 = arith.constant 0.000000e+00 : f32
    %7 = vector.broadcast %cst_6 : f32 to vector<512x128xf32>
    %8 = arith.cmpf ogt, %5, %7 : vector<512x128xf32>
    %9 = vector.broadcast %6 : f32 to vector<512x128xf32>
    %10 = arith.mulf %9, %5 : vector<512x128xf32>
    %11 = arith.select %8, %5, %10 : vector<512x128xi1>, vector<512x128xf32>
    %12 = arith.truncf %11 : vector<512x128xf32> to vector<512x128xbf16>
    %c0_7 = arith.constant 0 : index
    %c0_8 = arith.constant 0 : index
    %13 = vector.load %arg5[%c0_7, %c0_8] : memref<512x128xbf16, #tpu.memory_space<vmem>>, vector<512x128xbf16>
    tpu.vector_store %arg5[%c0_7, %c0_8], %12 {strides = array<i32>} : memref<512x128xbf16, #tpu.memory_space<vmem>>, vector<512x128xbf16>,
    return
  }
  func.func @transform_0(%arg0: i32) -> (i32, i32) {
    %c0_i32 = arith.constant 0 : i32
    %c0_i32_0 = arith.constant 0 : i32
    return %arg0, %c0_i32 : i32, i32
  }
  func.func @transform_1(%arg0: i32) -> (i32, i32) {
    %c0_i32 = arith.constant 0 : i32
    %c0_i32_0 = arith.constant 0 : i32
    %c0_i32_1 = arith.constant 0 : i32
    return %c0_i32, %c0_i32_0 : i32, i32
  }
  func.func @transform_2(%arg0: i32) -> (i32, i32) {
    %c0_i32 = arith.constant 0 : i32
    %c0_i32_0 = arith.constant 0 : i32
    %c0_i32_1 = arith.constant 0 : i32
    return %c0_i32, %c0_i32_0 : i32, i32
  }
  func.func @transform_3(%arg0: i32) -> i32 {
    %c0_i32 = arith.constant 0 : i32
    %c0_i32_0 = arith.constant 0 : i32
    return %c0_i32 : i32
  }
  func.func @transform_4(%arg0: i32) -> (i32, i32) {
    %c0_i32 = arith.constant 0 : i32
    %c0_i32_0 = arith.constant 0 : i32
    return %arg0, %c0_i32 : i32, i32
  }
}

</mosaic_0001>

<bundles_post_ra>
// kernel: tile.9
= control target key start
LH: loop header
LB: loop body
LE: loop exit
PB: predicated region body
PF: predicated region fallthrough
CT: control target
= control target key end

     0   :  { %s37_s8 = smov 32   ;;  %s38_s9 = smov 64   ;;  %vm7_vm0 = vcmask 261120   ;;  %vm13_vm1 = vcmask 1048320   ;;  %vm19_vm2 = vcmask 785920   ;;  %vm25_vm3 = vcmask 523520   ;;  %s55_s0 = inlined_call_operand.vmem [shape: f32[4,32], index: 0, kind: input, shape index: {}]   ;;  %s56_s1 = inlined_call_operand.vmem [shape: f32[1,128], index: 1, kind: output, shape index: {}]  }
   0x1   :  { %v4_v0 = vld [vmem:[%s55_s0] sm:$0xf]  ;;  %s36_s0 = smov 96  }
   0x2   :  { %5 = vst [vmem:[#allocation1] sm:$0xf] %v4_v0 }
   0x9   :  { %v10_v1 = vld [vmem:[#allocation1 + $0x3] sm:$0x1]   ;;  %v22_v2 = vld [vmem:[#allocation1 + $0x1] sm:$0x1]   ;;  %v16_v3 = vld [vmem:[#allocation1 + $0x2] sm:$0x1]  }
   0xa   :  { %11 = vrot.lane.b32.xlu0 %v10_v1, %s36_s0  ;;  %23 = vrot.lane.b32.xlu1 %v22_v2, %s37_s8  ;;  %v6_v4 = vld [vmem:[#allocation1] sm:$0x1]  }
   0xb   :  { %8 = vst.msk [vmem:[#allocation0] sm:$0x1] %vm7_vm0, %v6_v4  }
  0x12   :  { %17 = vrot.lane.b32.xlu0 %v16_v3, %s38_s9 }
  0x7c   :  { %v12_v5 = vpop.permute.xlu0 %11   ;;  %v24_v6 = vpop.permute.xlu1 %23  }
  0x7d   :  { %14 = vst.msk [vmem:[#allocation0] sm:$0x1] %vm13_vm1, %v12_v5  }
  0x84   :  { %v18_v7 = vpop.permute.xlu0 %17  }
  0x85   :  { %20 = vst.msk [vmem:[#allocation0] sm:$0x1] %vm19_vm2, %v18_v7  }
  0x86   :  { %26 = vst.msk [vmem:[#allocation0] sm:$0x1] %vm25_vm3, %v24_v6  }
  0x8d   :  { %v29_v8 = vld [vmem:[#allocation0] sm:$0x1] }
  0x8e   :  { %32 = vst [vmem:[%s56_s1] sm:$0x1] %v29_v8 }

// kernel: tile.8
= control target key start
LH: loop header
LB: loop body
LE: loop exit
PB: predicated region body
PF: predicated region fallthrough
CT: control target
= control target key end

     0   :  { %s22_s0 = inlined_call_operand.vmem [shape: f32[32], index: 0, kind: input, shape index: {}]   ;;  %s23_s1 = inlined_call_operand.vmem [shape: f32[4,32], index: 1, kind: output, shape index: {}]  }
   0x1   :  { %v4_v0 = vld [vmem:[%s22_s0] ss:$0 sm:$0xff] }
   0x2   :  { %5 = vst [vmem:[%s23_s1] sm:$0xf] %v4_v0 }

// kernel: deconv_block_forward.1
= control target key start
LH: loop header
LB: loop body
LE: loop exit
PB: predicated region body
PF: predicated region fallthrough
CT: control target
= control target key end

     0   :  { %s1544_s17 = smov 0   ;;  %s1795_s0 = inlined_call_operand.vmem [shape: bf16[1024,128], index: 0, kind: input, shape index: {}]   ;;  %s1796_s1 = inlined_call_operand.vmem [shape: bf16[128,128], index: 1, kind: input, shape index: {}]   ;;  %s1797_s2 = inlined_call_operand.vmem [shape: f32[1,128], index: 2, kind: input, shape index: {}]   ;;  %s1798_s3 = inlined_call_operand.<no memory space> [shape: f32[1], index: 3, kind: input, shape index: {}]   ;;  %s1799_s4 = inlined_call_operand.vmem [shape: bf16[1024,128], index: 4, kind: output, shape index: {}]  }
   0x1   :  { %9 = sst [smem:[#allocation2]] %s1798_s3 }
   0x2 LB: > { %s1073_s18 = sadd.s32 4294967295, %s1514_s17   ;;  %p1077_p0 = scmp.ge.s32.totalorder %s1514_s17, 1  ;;  %s1514_s17 = sphi %s1544_s17, %s15_s17  }
   0x3   : > { %p164_p1 = scmp.lt.s32.totalorder %s1514_s17, 3 }
   0x5   : > { %p165_p2 = pnand %p1077_p0, %p164_p1 }
   0x6   : > { %s1078_s26 = sshll.u32 (!%p165_p2), %s1073_s18, 6  ;;  %s695_s13 = sld [smem:[#allocation2]] (!%p165_p2) }
   0x7   : > { %168 = sbr.rel (%p165_p2) target bundleno = 306 (0x132), region = 36  ;;  %p191_p3 = scmp.lt.s32.totalorder (!%p165_p2), %s1078_s26, 127 }
   0xc   : > { %v1283_v0 = vld [vmem:[%s1796_s1 + $0x38] sm:$0xff]  ;;  %v1282_v1 = vld [vmem:[%s1796_s1 + $0x30] sm:$0xff]  ;;  %v1281_v2 = vld [vmem:[%s1796_s1 + $0x28] sm:$0xff]  ;;  %s1801_s26 = smov (!%p191_p3, %s1078_s26), 127  ;;  %v1625_v45 = vstv %s695_s13 }
   0xd   : > { %526 = vmatpush.bf16.msra.mxu0 %v1283_v0  ;;  %1475 = vmatpush.bf16.msra.mxu1 %v1283_v0  ;;  %v1280_v3 = vld [vmem:[%s1796_s1 + $0x20] sm:$0xff]  ;;  %v1279_v4 = vld [vmem:[%s1796_s1 + $0x18] sm:$0xff]  ;;  %v1278_v5 = vld [vmem:[%s1796_s1 + $0x10] sm:$0xff]  ;;  %s1079_s7 = sshll.u32 %s1801_s26, 2 }
   0xe   : > { %1476 = vmatpush.bf16.msra.mxu2 %v1283_v0  ;;  %1477 = vmatpush.bf16.msra.mxu3 %v1283_v0  ;;  %v1277_v6 = vld [vmem:[%s1796_s1 + $0x8] sm:$0xff]  ;;  %v1276_v7 = vld [vmem:[%s1796_s1] sm:$0xff]  ;;  %s1584_s12 = scalar_lea.vmem %s1795_s0, %s1079_s7  ;;  %s1640_s19 = scalar_lea.vmem %s1799_s4, %s1079_s7 }
   0xf   : > { %v1244_v8 = vld [vmem:[%s1584_s12] sm:$0xff]  ;;  %v1245_v12 = vld [vmem:[%s1584_s12 + $0x8] sm:$0xff]  ;;  %v1246_v16 = vld [vmem:[%s1584_s12 + $0x10] sm:$0xff] }
  0x10   : > { %v1252_v9 = vld [vmem:[%s1584_s12 + $0x40] sm:$0xff]  ;;  %v1253_v13 = vld [vmem:[%s1584_s12 + $0x48] sm:$0xff]  ;;  %v1254_v17 = vld [vmem:[%s1584_s12 + $0x50] sm:$0xff] }
  0x11   : > { %527 = vmatpush.bf16.msra.mxu0 %v1282_v1  ;;  %1478 = vmatpush.bf16.msra.mxu1 %v1282_v1  ;;  %v1260_v10 = vld [vmem:[%s1584_s12 + $0x80] sm:$0xff]  ;;  %v1261_v14 = vld [vmem:[%s1584_s12 + $0x88] sm:$0xff]  ;;  %v1262_v18 = vld [vmem:[%s1584_s12 + $0x90] sm:$0xff] }
  0x12   : > { %1479 = vmatpush.bf16.msra.mxu2 %v1282_v1  ;;  %1480 = vmatpush.bf16.msra.mxu3 %v1282_v1  ;;  %v1268_v11 = vld [vmem:[%s1584_s12 + $0xc0] sm:$0xff]  ;;  %v1269_v15 = vld [vmem:[%s1584_s12 + $0xc8] sm:$0xff]  ;;  %v1270_v19 = vld [vmem:[%s1584_s12 + $0xd0] sm:$0xff] }
  0x13   : > { %v1247_v20 = vld [vmem:[%s1584_s12 + $0x18] sm:$0xff]  ;;  %v1248_v24 = vld [vmem:[%s1584_s12 + $0x20] sm:$0xff]  ;;  %v1249_v28 = vld [vmem:[%s1584_s12 + $0x28] sm:$0xff] }
  0x14   : > { %v1255_v21 = vld [vmem:[%s1584_s12 + $0x58] sm:$0xff]  ;;  %v1256_v25 = vld [vmem:[%s1584_s12 + $0x60] sm:$0xff]  ;;  %v1257_v29 = vld [vmem:[%s1584_s12 + $0x68] sm:$0xff] }
  0x15   : > { %528 = vmatpush.bf16.msra.mxu0 %v1281_v2  ;;  %1481 = vmatpush.bf16.msra.mxu1 %v1281_v2  ;;  %v1263_v22 = vld [vmem:[%s1584_s12 + $0x98] sm:$0xff]  ;;  %v1264_v26 = vld [vmem:[%s1584_s12 + $0xa0] sm:$0xff]  ;;  %v1265_v30 = vld [vmem:[%s1584_s12 + $0xa8] sm:$0xff] }
  0x16   : > { %1482 = vmatpush.bf16.msra.mxu2 %v1281_v2  ;;  %1483 = vmatpush.bf16.msra.mxu3 %v1281_v2  ;;  %v1271_v23 = vld [vmem:[%s1584_s12 + $0xd8] sm:$0xff]  ;;  %v1272_v27 = vld [vmem:[%s1584_s12 + $0xe0] sm:$0xff]  ;;  %v1273_v31 = vld [vmem:[%s1584_s12 + $0xe8] sm:$0xff] }
  0x17   : > { %v1250_v32 = vld [vmem:[%s1584_s12 + $0x30] sm:$0xff]  ;;  %v1251_v36 = vld [vmem:[%s1584_s12 + $0x38] sm:$0xff]  ;;  %v1621_v42 = vld [vmem:[%s1797_s2] ss:$0 sm:$0xff] }
  0x18   : > { %v1258_v33 = vld [vmem:[%s1584_s12 + $0x70] sm:$0xff]  ;;  %v1259_v37 = vld [vmem:[%s1584_s12 + $0x78] sm:$0xff] }
  0x19   : > { %529 = vmatpush.bf16.msra.mxu0 %v1280_v3  ;;  %1484 = vmatpush.bf16.msra.mxu1 %v1280_v3  ;;  %v1266_v34 = vld [vmem:[%s1584_s12 + $0xb0] sm:$0xff]  ;;  %v1267_v38 = vld [vmem:[%s1584_s12 + $0xb8] sm:$0xff] }
  0x1a   : > { %1485 = vmatpush.bf16.msra.mxu2 %v1280_v3  ;;  %1486 = vmatpush.bf16.msra.mxu3 %v1280_v3  ;;  %v1274_v35 = vld [vmem:[%s1584_s12 + $0xf0] sm:$0xff]  ;;  %v1275_v39 = vld [vmem:[%s1584_s12 + $0xf8] sm:$0xff] }
  0x1d   : > { %530 = vmatpush.bf16.msra.mxu0 %v1279_v4  ;;  %1487 = vmatpush.bf16.msra.mxu1 %v1279_v4 }
  0x1e   : > { %1488 = vmatpush.bf16.msra.mxu2 %v1279_v4  ;;  %1489 = vmatpush.bf16.msra.mxu3 %v1279_v4 }
  0x21   : > { %531 = vmatpush.bf16.msra.mxu0 %v1278_v5  ;;  %1490 = vmatpush.bf16.msra.mxu1 %v1278_v5 }
  0x22   : > { %1491 = vmatpush.bf16.msra.mxu2 %v1278_v5  ;;  %1492 = vmatpush.bf16.msra.mxu3 %v1278_v5 }
  0x25   : > { %532 = vmatpush.bf16.msra.mxu0 %v1277_v6  ;;  %1493 = vmatpush.bf16.msra.mxu1 %v1277_v6 }
  0x26   : > { %1494 = vmatpush.bf16.msra.mxu2 %v1277_v6  ;;  %1495 = vmatpush.bf16.msra.mxu3 %v1277_v6 }
  0x29   : > { %533 = vmatpush.bf16.msra.mxu0 %v1276_v7  ;;  %1496 = vmatpush.bf16.msra.mxu1 %v1276_v7 }
  0x2a   : > { %1497 = vmatpush.bf16.msra.mxu2 %v1276_v7  ;;  %1498 = vmatpush.bf16.msra.mxu3 %v1276_v7 }
  0x2c   : > { %534 = vmatmul.bf16.vlgmr.msra.gmra.mxu0 %v1244_v8  ;;  %574 = vmatmul.bf16.vlgmr.msra.gmra.mxu1 %v1252_v9 }
  0x2d   : > { %614 = vmatmul.bf16.vlgmr.msra.gmra.mxu2 %v1260_v10  ;;  %654 = vmatmul.bf16.vlgmr.msra.gmra.mxu3 %v1268_v11 }
  0x3c   : > { %539 = vmatmul.bf16.gmra.mxu0 %v1245_v12  ;;  %579 = vmatmul.bf16.gmra.mxu1 %v1253_v13 }
  0x3d   : > { %619 = vmatmul.bf16.gmra.mxu2 %v1261_v14  ;;  %659 = vmatmul.bf16.gmra.mxu3 %v1269_v15 }
  0x4c   : > { %544 = vmatmul.bf16.gmra.mxu0 %v1246_v16  ;;  %584 = vmatmul.bf16.gmra.mxu1 %v1254_v17 }
  0x4d   : > { %624 = vmatmul.bf16.gmra.mxu2 %v1262_v18  ;;  %664 = vmatmul.bf16.gmra.mxu3 %v1270_v19 }
  0x5c   : > { %549 = vmatmul.bf16.gmra.mxu0 %v1247_v20  ;;  %589 = vmatmul.bf16.gmra.mxu1 %v1255_v21 }
  0x5d   : > { %629 = vmatmul.bf16.gmra.mxu2 %v1263_v22  ;;  %669 = vmatmul.bf16.gmra.mxu3 %v1271_v23 }
  0x6c   : > { %554 = vmatmul.bf16.gmra.mxu0 %v1248_v24  ;;  %594 = vmatmul.bf16.gmra.mxu1 %v1256_v25 }
  0x6d   : > { %634 = vmatmul.bf16.gmra.mxu2 %v1264_v26  ;;  %674 = vmatmul.bf16.gmra.mxu3 %v1272_v27 }
  0x7c   : > { %559 = vmatmul.bf16.gmra.mxu0 %v1249_v28  ;;  %599 = vmatmul.bf16.gmra.mxu1 %v1257_v29 }
  0x7d   : > { %639 = vmatmul.bf16.gmra.mxu2 %v1265_v30  ;;  %679 = vmatmul.bf16.gmra.mxu3 %v1273_v31 }
  0x8c   : > { %564 = vmatmul.bf16.gmra.mxu0 %v1250_v32  ;;  %604 = vmatmul.bf16.gmra.mxu1 %v1258_v33 }
  0x8d   : > { %644 = vmatmul.bf16.gmra.mxu2 %v1266_v34  ;;  %684 = vmatmul.bf16.gmra.mxu3 %v1274_v35 }
  0x9c   : > { %569 = vmatmul.bf16.gmra.mxu0 %v1251_v36  ;;  %609 = vmatmul.bf16.gmra.mxu1 %v1259_v37 }
  0x9d   : > { %649 = vmatmul.bf16.gmra.mxu2 %v1267_v38  ;;  %689 = vmatmul.bf16.gmra.mxu3 %v1275_v39 }
  0xa9   : > { %v535_v40 = vpop.f32.mrf.mxu0  ;;  %v575_v41 = vpop.f32.mrf.mxu1 }
  0xaa   : > { %v536_v43 = vadd.f32 %v1621_v42, %v535_v40  ;;  %v576_v44 = vadd.f32 %v1621_v42, %v575_v41 }
  0xac   : > { %v761_v50 = vmul.f32 %v1625_v45, %v536_v43  ;;  %v777_v51 = vmul.f32 %v1625_v45, %v576_v44  ;;  %vm696_vm0 = vcmp.gt.f32.partialorder %v536_v43, 0.0  ;;  %vm712_vm1 = vcmp.gt.f32.partialorder %v576_v44, 0.0 }
  0xae   : > { %v825_v58 = vsel %vm696_vm0, %v536_v43, %v761_v50  ;;  %v841_v59 = vsel %vm712_vm1, %v576_v44, %v777_v51 }
  0xb0   : > { %v615_v46 = vpop.f32.mrf.mxu2  ;;  %v655_v47 = vpop.f32.mrf.mxu3 }
  0xb1   : > { %v537_v48 = vpop.f32.mrf.mxu0  ;;  %v577_v49 = vpop.f32.mrf.mxu1  ;;  %v616_v56 = vadd.f32 %v1621_v42, %v615_v46  ;;  %v656_v57 = vadd.f32 %v1621_v42, %v655_v47 }
  0xb2   : > { %v538_v52 = vadd.f32 %v1621_v42, %v537_v48  ;;  %v578_v53 = vadd.f32 %v1621_v42, %v577_v49 }
  0xb3   : > { %v793_v2 = vmul.f32 %v1625_v45, %v616_v56  ;;  %v809_v3 = vmul.f32 %v1625_v45, %v656_v57  ;;  %vm728_vm4 = vcmp.gt.f32.partialorder %v616_v56, 0.0  ;;  %vm744_vm5 = vcmp.gt.f32.partialorder %v656_v57, 0.0 }
  0xb4   : > { %vm697_vm2 = vcmp.gt.f32.partialorder %v538_v52, 0.0  ;;  %v762_v54 = vmul.f32 %v1625_v45, %v538_v52  ;;  %vm713_vm3 = vcmp.gt.f32.partialorder %v578_v53, 0.0  ;;  %v778_v55 = vmul.f32 %v1625_v45, %v578_v53 }
  0xb5   : > { %v857_v10 = vsel %vm728_vm4, %v616_v56, %v793_v2  ;;  %v873_v11 = vsel %vm744_vm5, %v656_v57, %v809_v3 }
  0xb6   : > { %v826_v60 = vsel %vm697_vm2, %v538_v52, %v762_v54  ;;  %v842_v61 = vsel %vm713_vm3, %v578_v53, %v778_v55 }
  0xb7   : > { %v1287_v62 = vpack.c.bf16 %v826_v60, %v825_v58  ;;  %v1327_v63 = vpack.c.bf16 %v842_v61, %v841_v59 }
  0xb8   : > { %v617_v0 = vpop.f32.mrf.mxu2  ;;  %v657_v1 = vpop.f32.mrf.mxu3 }
  0xb9   : > { %1288 = vst [vmem:[%s1640_s19] sm:$0xff] %v1287_v62   ;;  %v618_v4 = vadd.f32 %v1621_v42, %v617_v0  ;;  %v658_v5 = vadd.f32 %v1621_v42, %v657_v1  ;;  %v540_v6 = vpop.f32.mrf.mxu0  ;;  %v580_v7 = vpop.f32.mrf.mxu1 }
  0xba   : > { %1451 = vst [vmem:[%s1640_s19 + $0x40] sm:$0xff] %v1327_v63   ;;  %v541_v16 = vadd.f32 %v1621_v42, %v540_v6  ;;  %v581_v17 = vadd.f32 %v1621_v42, %v580_v7 }
  0xbb   : > { %vm729_vm6 = vcmp.gt.f32.partialorder %v618_v4, 0.0  ;;  %v794_v8 = vmul.f32 %v1625_v45, %v618_v4  ;;  %vm745_vm7 = vcmp.gt.f32.partialorder %v658_v5, 0.0  ;;  %v810_v9 = vmul.f32 %v1625_v45, %v658_v5 }
  0xbc   : > { %v763_v22 = vmul.f32 %v1625_v45, %v541_v16  ;;  %v779_v23 = vmul.f32 %v1625_v45, %v581_v17  ;;  %vm698_vm8 = vcmp.gt.f32.partialorder %v541_v16, 0.0  ;;  %vm714_vm9 = vcmp.gt.f32.partialorder %v581_v17, 0.0 }
  0xbd   : > { %v858_v12 = vsel %vm729_vm6, %v618_v4, %v794_v8  ;;  %v874_v13 = vsel %vm745_vm7, %v658_v5, %v810_v9 }
  0xbe   : > { %v1367_v14 = vpack.c.bf16 %v858_v12, %v857_v10  ;;  %v1407_v15 = vpack.c.bf16 %v874_v13, %v873_v11  ;;  %v827_v30 = vsel %vm698_vm8, %v541_v16, %v763_v22  ;;  %v843_v31 = vsel %vm714_vm9, %v581_v17, %v779_v23 }
  0xc0   : > { %1459 = vst [vmem:[%s1640_s19 + $0x80] sm:$0xff] %v1367_v14   ;;  %v620_v18 = vpop.f32.mrf.mxu2  ;;  %v660_v19 = vpop.f32.mrf.mxu3 }
  0xc1   : > { %1467 = vst [vmem:[%s1640_s19 + $0xc0] sm:$0xff] %v1407_v15   ;;  %v542_v20 = vpop.f32.mrf.mxu0  ;;  %v582_v21 = vpop.f32.mrf.mxu1  ;;  %v621_v28 = vadd.f32 %v1621_v42, %v620_v18  ;;  %v661_v29 = vadd.f32 %v1621_v42, %v660_v19 }
  0xc2   : > { %v543_v24 = vadd.f32 %v1621_v42, %v542_v20  ;;  %v583_v25 = vadd.f32 %v1621_v42, %v582_v21 }
  0xc3   : > { %v795_v38 = vmul.f32 %v1625_v45, %v621_v28  ;;  %v811_v39 = vmul.f32 %v1625_v45, %v661_v29  ;;  %vm730_vm12 = vcmp.gt.f32.partialorder %v621_v28, 0.0  ;;  %vm746_vm13 = vcmp.gt.f32.partialorder %v661_v29, 0.0 }
  0xc4   : > { %vm699_vm10 = vcmp.gt.f32.partialorder %v543_v24, 0.0  ;;  %v764_v26 = vmul.f32 %v1625_v45, %v543_v24  ;;  %vm715_vm11 = vcmp.gt.f32.partialorder %v583_v25, 0.0  ;;  %v780_v27 = vmul.f32 %v1625_v45, %v583_v25 }
  0xc5   : > { %v859_v48 = vsel %vm730_vm12, %v621_v28, %v795_v38  ;;  %v875_v49 = vsel %vm746_vm13, %v661_v29, %v811_v39 }
  0xc6   : > { %v828_v32 = vsel %vm699_vm10, %v543_v24, %v764_v26  ;;  %v844_v33 = vsel %vm715_vm11, %v583_v25, %v780_v27 }
  0xc7   : > { %v1292_v34 = vpack.c.bf16 %v828_v32, %v827_v30  ;;  %v1332_v35 = vpack.c.bf16 %v844_v33, %v843_v31 }
  0xc8   : > { %v622_v36 = vpop.f32.mrf.mxu2  ;;  %v662_v37 = vpop.f32.mrf.mxu3 }
  0xc9   : > { %1444 = vst [vmem:[%s1640_s19 + $0x8] sm:$0xff] %v1292_v34   ;;  %v623_v40 = vadd.f32 %v1621_v42, %v622_v36  ;;  %v663_v41 = vadd.f32 %v1621_v42, %v662_v37  ;;  %v545_v43 = vpop.f32.mrf.mxu0  ;;  %v585_v44 = vpop.f32.mrf.mxu1 }
  0xca   : > { %1452 = vst [vmem:[%s1640_s19 + $0x48] sm:$0xff] %v1332_v35   ;;  %v546_v54 = vadd.f32 %v1621_v42, %v545_v43  ;;  %v586_v55 = vadd.f32 %v1621_v42, %v585_v44 }
  0xcb   : > { %vm731_vm14 = vcmp.gt.f32.partialorder %v623_v40, 0.0  ;;  %v796_v46 = vmul.f32 %v1625_v45, %v623_v40  ;;  %vm747_vm15 = vcmp.gt.f32.partialorder %v663_v41, 0.0  ;;  %v812_v47 = vmul.f32 %v1625_v45, %v663_v41 }
  0xcc   : > { %v765_v60 = vmul.f32 %v1625_v45, %v546_v54  ;;  %v781_v61 = vmul.f32 %v1625_v45, %v586_v55  ;;  %vm700_vm0 = vcmp.gt.f32.partialorder %v546_v54, 0.0  ;;  %vm716_vm1 = vcmp.gt.f32.partialorder %v586_v55, 0.0 }
  0xcd   : > { %v860_v50 = vsel %vm731_vm14, %v623_v40, %v796_v46  ;;  %v876_v51 = vsel %vm747_vm15, %v663_v41, %v812_v47 }
  0xce   : > { %v1372_v52 = vpack.c.bf16 %v860_v50, %v859_v48  ;;  %v1412_v53 = vpack.c.bf16 %v876_v51, %v875_v49  ;;  %v829_v4 = vsel %vm700_vm0, %v546_v54, %v765_v60  ;;  %v845_v5 = vsel %vm716_vm1, %v586_v55, %v781_v61 }
  0xd0   : > { %1460 = vst [vmem:[%s1640_s19 + $0x88] sm:$0xff] %v1372_v52   ;;  %v625_v56 = vpop.f32.mrf.mxu2  ;;  %v665_v57 = vpop.f32.mrf.mxu3 }
  0xd1   : > { %1468 = vst [vmem:[%s1640_s19 + $0xc8] sm:$0xff] %v1412_v53   ;;  %v547_v58 = vpop.f32.mrf.mxu0  ;;  %v587_v59 = vpop.f32.mrf.mxu1  ;;  %v626_v2 = vadd.f32 %v1621_v42, %v625_v56  ;;  %v666_v3 = vadd.f32 %v1621_v42, %v665_v57 }
  0xd2   : > { %v548_v62 = vadd.f32 %v1621_v42, %v547_v58  ;;  %v588_v63 = vadd.f32 %v1621_v42, %v587_v59 }
  0xd3   : > { %v797_v12 = vmul.f32 %v1625_v45, %v626_v2  ;;  %v813_v13 = vmul.f32 %v1625_v45, %v666_v3  ;;  %vm732_vm4 = vcmp.gt.f32.partialorder %v626_v2, 0.0  ;;  %vm748_vm5 = vcmp.gt.f32.partialorder %v666_v3, 0.0 }
  0xd4   : > { %vm701_vm2 = vcmp.gt.f32.partialorder %v548_v62, 0.0  ;;  %v766_v0 = vmul.f32 %v1625_v45, %v548_v62  ;;  %vm717_vm3 = vcmp.gt.f32.partialorder %v588_v63, 0.0  ;;  %v782_v1 = vmul.f32 %v1625_v45, %v588_v63 }
  0xd5   : > { %v861_v20 = vsel %vm732_vm4, %v626_v2, %v797_v12  ;;  %v877_v21 = vsel %vm748_vm5, %v666_v3, %v813_v13 }
  0xd6   : > { %v830_v6 = vsel %vm701_vm2, %v548_v62, %v766_v0  ;;  %v846_v7 = vsel %vm717_vm3, %v588_v63, %v782_v1 }
  0xd7   : > { %v1297_v8 = vpack.c.bf16 %v830_v6, %v829_v4  ;;  %v1337_v9 = vpack.c.bf16 %v846_v7, %v845_v5 }
  0xd8   : > { %v627_v10 = vpop.f32.mrf.mxu2  ;;  %v667_v11 = vpop.f32.mrf.mxu3 }
  0xd9   : > { %1445 = vst [vmem:[%s1640_s19 + $0x10] sm:$0xff] %v1297_v8   ;;  %v628_v14 = vadd.f32 %v1621_v42, %v627_v10  ;;  %v668_v15 = vadd.f32 %v1621_v42, %v667_v11  ;;  %v550_v16 = vpop.f32.mrf.mxu0  ;;  %v590_v17 = vpop.f32.mrf.mxu1 }
  0xda   : > { %1453 = vst [vmem:[%s1640_s19 + $0x50] sm:$0xff] %v1337_v9   ;;  %v551_v26 = vadd.f32 %v1621_v42, %v550_v16  ;;  %v591_v27 = vadd.f32 %v1621_v42, %v590_v17 }
  0xdb   : > { %vm733_vm6 = vcmp.gt.f32.partialorder %v628_v14, 0.0  ;;  %v798_v18 = vmul.f32 %v1625_v45, %v628_v14  ;;  %vm749_vm7 = vcmp.gt.f32.partialorder %v668_v15, 0.0  ;;  %v814_v19 = vmul.f32 %v1625_v45, %v668_v15 }
  0xdc   : > { %v767_v32 = vmul.f32 %v1625_v45, %v551_v26  ;;  %v783_v33 = vmul.f32 %v1625_v45, %v591_v27  ;;  %vm702_vm8 = vcmp.gt.f32.partialorder %v551_v26, 0.0  ;;  %vm718_vm9 = vcmp.gt.f32.partialorder %v591_v27, 0.0 }
  0xdd   : > { %v862_v22 = vsel %vm733_vm6, %v628_v14, %v798_v18  ;;  %v878_v23 = vsel %vm749_vm7, %v668_v15, %v814_v19 }
  0xde   : > { %v1377_v24 = vpack.c.bf16 %v862_v22, %v861_v20  ;;  %v1417_v25 = vpack.c.bf16 %v878_v23, %v877_v21  ;;  %v831_v40 = vsel %vm702_vm8, %v551_v26, %v767_v32  ;;  %v847_v41 = vsel %vm718_vm9, %v591_v27, %v783_v33 }
  0xe0   : > { %1461 = vst [vmem:[%s1640_s19 + $0x90] sm:$0xff] %v1377_v24   ;;  %v630_v28 = vpop.f32.mrf.mxu2  ;;  %v670_v29 = vpop.f32.mrf.mxu3 }
  0xe1   : > { %1469 = vst [vmem:[%s1640_s19 + $0xd0] sm:$0xff] %v1417_v25   ;;  %v552_v30 = vpop.f32.mrf.mxu0  ;;  %v592_v31 = vpop.f32.mrf.mxu1  ;;  %v631_v38 = vadd.f32 %v1621_v42, %v630_v28  ;;  %v671_v39 = vadd.f32 %v1621_v42, %v670_v29 }
  0xe2   : > { %v553_v34 = vadd.f32 %v1621_v42, %v552_v30  ;;  %v593_v35 = vadd.f32 %v1621_v42, %v592_v31 }
  0xe3   : > { %v799_v50 = vmul.f32 %v1625_v45, %v631_v38  ;;  %v815_v51 = vmul.f32 %v1625_v45, %v671_v39  ;;  %vm734_vm12 = vcmp.gt.f32.partialorder %v631_v38, 0.0  ;;  %vm750_vm13 = vcmp.gt.f32.partialorder %v671_v39, 0.0 }
  0xe4   : > { %vm703_vm10 = vcmp.gt.f32.partialorder %v553_v34, 0.0  ;;  %v768_v36 = vmul.f32 %v1625_v45, %v553_v34  ;;  %vm719_vm11 = vcmp.gt.f32.partialorder %v593_v35, 0.0  ;;  %v784_v37 = vmul.f32 %v1625_v45, %v593_v35 }
  0xe5   : > { %v863_v58 = vsel %vm734_vm12, %v631_v38, %v799_v50  ;;  %v879_v59 = vsel %vm750_vm13, %v671_v39, %v815_v51 }
  0xe6   : > { %v832_v43 = vsel %vm703_vm10, %v553_v34, %v768_v36  ;;  %v848_v44 = vsel %vm719_vm11, %v593_v35, %v784_v37 }
  0xe7   : > { %v1302_v46 = vpack.c.bf16 %v832_v43, %v831_v40  ;;  %v1342_v47 = vpack.c.bf16 %v848_v44, %v847_v41 }
  0xe8   : > { %v632_v48 = vpop.f32.mrf.mxu2  ;;  %v672_v49 = vpop.f32.mrf.mxu3 }
  0xe9   : > { %1446 = vst [vmem:[%s1640_s19 + $0x18] sm:$0xff] %v1302_v46   ;;  %v633_v52 = vadd.f32 %v1621_v42, %v632_v48  ;;  %v673_v53 = vadd.f32 %v1621_v42, %v672_v49  ;;  %v555_v54 = vpop.f32.mrf.mxu0  ;;  %v595_v55 = vpop.f32.mrf.mxu1 }
  0xea   : > { %1454 = vst [vmem:[%s1640_s19 + $0x58] sm:$0xff] %v1342_v47   ;;  %v556_v0 = vadd.f32 %v1621_v42, %v555_v54  ;;  %v596_v1 = vadd.f32 %v1621_v42, %v595_v55 }
  0xeb   : > { %vm735_vm14 = vcmp.gt.f32.partialorder %v633_v52, 0.0  ;;  %v800_v56 = vmul.f32 %v1625_v45, %v633_v52  ;;  %vm751_vm15 = vcmp.gt.f32.partialorder %v673_v53, 0.0  ;;  %v816_v57 = vmul.f32 %v1625_v45, %v673_v53 }
  0xec   : > { %v769_v6 = vmul.f32 %v1625_v45, %v556_v0  ;;  %v785_v7 = vmul.f32 %v1625_v45, %v596_v1  ;;  %vm704_vm0 = vcmp.gt.f32.partialorder %v556_v0, 0.0  ;;  %vm720_vm1 = vcmp.gt.f32.partialorder %v596_v1, 0.0 }
  0xed   : > { %v864_v60 = vsel %vm735_vm14, %v633_v52, %v800_v56  ;;  %v880_v61 = vsel %vm751_vm15, %v673_v53, %v816_v57 }
  0xee   : > { %v1382_v62 = vpack.c.bf16 %v864_v60, %v863_v58  ;;  %v1422_v63 = vpack.c.bf16 %v880_v61, %v879_v59  ;;  %v833_v14 = vsel %vm704_vm0, %v556_v0, %v769_v6  ;;  %v849_v15 = vsel %vm720_vm1, %v596_v1, %v785_v7 }
  0xf0   : > { %1462 = vst [vmem:[%s1640_s19 + $0x98] sm:$0xff] %v1382_v62   ;;  %v635_v2 = vpop.f32.mrf.mxu2  ;;  %v675_v3 = vpop.f32.mrf.mxu3 }
  0xf1   : > { %1470 = vst [vmem:[%s1640_s19 + $0xd8] sm:$0xff] %v1422_v63   ;;  %v557_v4 = vpop.f32.mrf.mxu0  ;;  %v597_v5 = vpop.f32.mrf.mxu1  ;;  %v636_v12 = vadd.f32 %v1621_v42, %v635_v2  ;;  %v676_v13 = vadd.f32 %v1621_v42, %v675_v3 }
  0xf2   : > { %v558_v8 = vadd.f32 %v1621_v42, %v557_v4  ;;  %v598_v9 = vadd.f32 %v1621_v42, %v597_v5 }
  0xf3   : > { %v801_v22 = vmul.f32 %v1625_v45, %v636_v12  ;;  %v817_v23 = vmul.f32 %v1625_v45, %v676_v13  ;;  %vm736_vm4 = vcmp.gt.f32.partialorder %v636_v12, 0.0  ;;  %vm752_vm5 = vcmp.gt.f32.partialorder %v676_v13, 0.0 }
  0xf4   : > { %vm705_vm2 = vcmp.gt.f32.partialorder %v558_v8, 0.0  ;;  %v770_v10 = vmul.f32 %v1625_v45, %v558_v8  ;;  %vm721_vm3 = vcmp.gt.f32.partialorder %v598_v9, 0.0  ;;  %v786_v11 = vmul.f32 %v1625_v45, %v598_v9 }
  0xf5   : > { %v865_v30 = vsel %vm736_vm4, %v636_v12, %v801_v22  ;;  %v881_v31 = vsel %vm752_vm5, %v676_v13, %v817_v23 }
  0xf6   : > { %v834_v16 = vsel %vm705_vm2, %v558_v8, %v770_v10  ;;  %v850_v17 = vsel %vm721_vm3, %v598_v9, %v786_v11 }
  0xf7   : > { %v1307_v18 = vpack.c.bf16 %v834_v16, %v833_v14  ;;  %v1347_v19 = vpack.c.bf16 %v850_v17, %v849_v15 }
  0xf8   : > { %v637_v20 = vpop.f32.mrf.mxu2  ;;  %v677_v21 = vpop.f32.mrf.mxu3 }
  0xf9   : > { %1447 = vst [vmem:[%s1640_s19 + $0x20] sm:$0xff] %v1307_v18   ;;  %v638_v24 = vadd.f32 %v1621_v42, %v637_v20  ;;  %v678_v25 = vadd.f32 %v1621_v42, %v677_v21  ;;  %v560_v26 = vpop.f32.mrf.mxu0  ;;  %v600_v27 = vpop.f32.mrf.mxu1 }
  0xfa   : > { %1455 = vst [vmem:[%s1640_s19 + $0x60] sm:$0xff] %v1347_v19   ;;  %v561_v36 = vadd.f32 %v1621_v42, %v560_v26  ;;  %v601_v37 = vadd.f32 %v1621_v42, %v600_v27 }
  0xfb   : > { %vm737_vm6 = vcmp.gt.f32.partialorder %v638_v24, 0.0  ;;  %v802_v28 = vmul.f32 %v1625_v45, %v638_v24  ;;  %vm753_vm7 = vcmp.gt.f32.partialorder %v678_v25, 0.0  ;;  %v818_v29 = vmul.f32 %v1625_v45, %v678_v25 }
  0xfc   : > { %v771_v43 = vmul.f32 %v1625_v45, %v561_v36  ;;  %v787_v44 = vmul.f32 %v1625_v45, %v601_v37  ;;  %vm706_vm8 = vcmp.gt.f32.partialorder %v561_v36, 0.0  ;;  %vm722_vm9 = vcmp.gt.f32.partialorder %v601_v37, 0.0 }
  0xfd   : > { %v866_v32 = vsel %vm737_vm6, %v638_v24, %v802_v28  ;;  %v882_v33 = vsel %vm753_vm7, %v678_v25, %v818_v29 }
  0xfe   : > { %v1387_v34 = vpack.c.bf16 %v866_v32, %v865_v30  ;;  %v1427_v35 = vpack.c.bf16 %v882_v33, %v881_v31  ;;  %v835_v52 = vsel %vm706_vm8, %v561_v36, %v771_v43  ;;  %v851_v53 = vsel %vm722_vm9, %v601_v37, %v787_v44 }
 0x100   : > { %1463 = vst [vmem:[%s1640_s19 + $0xa0] sm:$0xff] %v1387_v34   ;;  %v640_v38 = vpop.f32.mrf.mxu2  ;;  %v680_v39 = vpop.f32.mrf.mxu3 }
 0x101   : > { %1471 = vst [vmem:[%s1640_s19 + $0xe0] sm:$0xff] %v1427_v35   ;;  %v562_v40 = vpop.f32.mrf.mxu0  ;;  %v602_v41 = vpop.f32.mrf.mxu1  ;;  %v641_v50 = vadd.f32 %v1621_v42, %v640_v38  ;;  %v681_v51 = vadd.f32 %v1621_v42, %v680_v39 }
 0x102   : > { %v563_v46 = vadd.f32 %v1621_v42, %v562_v40  ;;  %v603_v47 = vadd.f32 %v1621_v42, %v602_v41 }
 0x103   : > { %v803_v60 = vmul.f32 %v1625_v45, %v641_v50  ;;  %v819_v61 = vmul.f32 %v1625_v45, %v681_v51  ;;  %vm738_vm12 = vcmp.gt.f32.partialorder %v641_v50, 0.0  ;;  %vm754_vm13 = vcmp.gt.f32.partialorder %v681_v51, 0.0 }
 0x104   : > { %vm707_vm10 = vcmp.gt.f32.partialorder %v563_v46, 0.0  ;;  %v772_v48 = vmul.f32 %v1625_v45, %v563_v46  ;;  %vm723_vm11 = vcmp.gt.f32.partialorder %v603_v47, 0.0  ;;  %v788_v49 = vmul.f32 %v1625_v45, %v603_v47 }
 0x105   : > { %v867_v4 = vsel %vm738_vm12, %v641_v50, %v803_v60  ;;  %v883_v5 = vsel %vm754_vm13, %v681_v51, %v819_v61 }
 0x106   : > { %v836_v54 = vsel %vm707_vm10, %v563_v46, %v772_v48  ;;  %v852_v55 = vsel %vm723_vm11, %v603_v47, %v788_v49 }
 0x107   : > { %v1312_v56 = vpack.c.bf16 %v836_v54, %v835_v52  ;;  %v1352_v57 = vpack.c.bf16 %v852_v55, %v851_v53 }
 0x108   : > { %v642_v58 = vpop.f32.mrf.mxu2  ;;  %v682_v59 = vpop.f32.mrf.mxu3 }
 0x109   : > { %1448 = vst [vmem:[%s1640_s19 + $0x28] sm:$0xff] %v1312_v56   ;;  %v643_v62 = vadd.f32 %v1621_v42, %v642_v58  ;;  %v683_v63 = vadd.f32 %v1621_v42, %v682_v59  ;;  %v565_v0 = vpop.f32.mrf.mxu0  ;;  %v605_v1 = vpop.f32.mrf.mxu1 }
 0x10a   : > { %1456 = vst [vmem:[%s1640_s19 + $0x68] sm:$0xff] %v1352_v57   ;;  %v566_v10 = vadd.f32 %v1621_v42, %v565_v0  ;;  %v606_v11 = vadd.f32 %v1621_v42, %v605_v1 }
 0x10b   : > { %vm739_vm14 = vcmp.gt.f32.partialorder %v643_v62, 0.0  ;;  %v804_v2 = vmul.f32 %v1625_v45, %v643_v62  ;;  %vm755_vm15 = vcmp.gt.f32.partialorder %v683_v63, 0.0  ;;  %v820_v3 = vmul.f32 %v1625_v45, %v683_v63 }
 0x10c   : > { %v773_v16 = vmul.f32 %v1625_v45, %v566_v10  ;;  %v789_v17 = vmul.f32 %v1625_v45, %v606_v11  ;;  %vm708_vm0 = vcmp.gt.f32.partialorder %v566_v10, 0.0  ;;  %vm724_vm1 = vcmp.gt.f32.partialorder %v606_v11, 0.0 }
 0x10d   : > { %v868_v6 = vsel %vm739_vm14, %v643_v62, %v804_v2  ;;  %v884_v7 = vsel %vm755_vm15, %v683_v63, %v820_v3 }
 0x10e   : > { %v1392_v8 = vpack.c.bf16 %v868_v6, %v867_v4  ;;  %v1432_v9 = vpack.c.bf16 %v884_v7, %v883_v5  ;;  %v837_v24 = vsel %vm708_vm0, %v566_v10, %v773_v16  ;;  %v853_v25 = vsel %vm724_vm1, %v606_v11, %v789_v17 }
 0x110   : > { %1464 = vst [vmem:[%s1640_s19 + $0xa8] sm:$0xff] %v1392_v8   ;;  %v645_v12 = vpop.f32.mrf.mxu2  ;;  %v685_v13 = vpop.f32.mrf.mxu3 }
 0x111   : > { %1472 = vst [vmem:[%s1640_s19 + $0xe8] sm:$0xff] %v1432_v9   ;;  %v567_v14 = vpop.f32.mrf.mxu0  ;;  %v607_v15 = vpop.f32.mrf.mxu1  ;;  %v646_v22 = vadd.f32 %v1621_v42, %v645_v12  ;;  %v686_v23 = vadd.f32 %v1621_v42, %v685_v13 }
 0x112   : > { %v568_v18 = vadd.f32 %v1621_v42, %v567_v14  ;;  %v608_v19 = vadd.f32 %v1621_v42, %v607_v15 }
 0x113   : > { %v805_v32 = vmul.f32 %v1625_v45, %v646_v22  ;;  %v821_v33 = vmul.f32 %v1625_v45, %v686_v23  ;;  %vm740_vm4 = vcmp.gt.f32.partialorder %v646_v22, 0.0  ;;  %vm756_vm5 = vcmp.gt.f32.partialorder %v686_v23, 0.0 }
 0x114   : > { %vm709_vm2 = vcmp.gt.f32.partialorder %v568_v18, 0.0  ;;  %v774_v20 = vmul.f32 %v1625_v45, %v568_v18  ;;  %vm725_vm3 = vcmp.gt.f32.partialorder %v608_v19, 0.0  ;;  %v790_v21 = vmul.f32 %v1625_v45, %v608_v19 }
 0x115   : > { %v869_v40 = vsel %vm740_vm4, %v646_v22, %v805_v32  ;;  %v885_v41 = vsel %vm756_vm5, %v686_v23, %v821_v33 }
 0x116   : > { %v838_v26 = vsel %vm709_vm2, %v568_v18, %v774_v20  ;;  %v854_v27 = vsel %vm725_vm3, %v608_v19, %v790_v21 }
 0x117   : > { %v1317_v28 = vpack.c.bf16 %v838_v26, %v837_v24  ;;  %v1357_v29 = vpack.c.bf16 %v854_v27, %v853_v25 }
 0x118   : > { %v647_v30 = vpop.f32.mrf.mxu2  ;;  %v687_v31 = vpop.f32.mrf.mxu3 }
 0x119   : > { %1449 = vst [vmem:[%s1640_s19 + $0x30] sm:$0xff] %v1317_v28   ;;  %v648_v34 = vadd.f32 %v1621_v42, %v647_v30  ;;  %v688_v35 = vadd.f32 %v1621_v42, %v687_v31  ;;  %v570_v36 = vpop.f32.mrf.mxu0  ;;  %v610_v37 = vpop.f32.mrf.mxu1 }
 0x11a   : > { %1457 = vst [vmem:[%s1640_s19 + $0x70] sm:$0xff] %v1357_v29   ;;  %v571_v48 = vadd.f32 %v1621_v42, %v570_v36  ;;  %v611_v49 = vadd.f32 %v1621_v42, %v610_v37 }
 0x11b   : > { %vm741_vm6 = vcmp.gt.f32.partialorder %v648_v34, 0.0  ;;  %v806_v38 = vmul.f32 %v1625_v45, %v648_v34  ;;  %vm757_vm7 = vcmp.gt.f32.partialorder %v688_v35, 0.0  ;;  %v822_v39 = vmul.f32 %v1625_v45, %v688_v35 }
 0x11c   : > { %v775_v54 = vmul.f32 %v1625_v45, %v571_v48  ;;  %v791_v55 = vmul.f32 %v1625_v45, %v611_v49  ;;  %vm710_vm8 = vcmp.gt.f32.partialorder %v571_v48, 0.0  ;;  %vm726_vm9 = vcmp.gt.f32.partialorder %v611_v49, 0.0 }
 0x11d   : > { %v870_v43 = vsel %vm741_vm6, %v648_v34, %v806_v38  ;;  %v886_v44 = vsel %vm757_vm7, %v688_v35, %v822_v39 }
 0x11e   : > { %v1397_v46 = vpack.c.bf16 %v870_v43, %v869_v40  ;;  %v1437_v47 = vpack.c.bf16 %v886_v44, %v885_v41  ;;  %v839_v62 = vsel %vm710_vm8, %v571_v48, %v775_v54  ;;  %v855_v63 = vsel %vm726_vm9, %v611_v49, %v791_v55 }
 0x120   : > { %1465 = vst [vmem:[%s1640_s19 + $0xb0] sm:$0xff] %v1397_v46   ;;  %v650_v50 = vpop.f32.mrf.mxu2  ;;  %v690_v51 = vpop.f32.mrf.mxu3 }
 0x121   : > { %1473 = vst [vmem:[%s1640_s19 + $0xf0] sm:$0xff] %v1437_v47   ;;  %v572_v52 = vpop.f32.mrf.mxu0  ;;  %v612_v53 = vpop.f32.mrf.mxu1  ;;  %v651_v60 = vadd.f32 %v1621_v42, %v650_v50  ;;  %v691_v61 = vadd.f32 %v1621_v42, %v690_v51 }
 0x122   : > { %v573_v56 = vadd.f32 %v1621_v42, %v572_v52  ;;  %v613_v57 = vadd.f32 %v1621_v42, %v612_v53 }
 0x123   : > { %v807_v6 = vmul.f32 %v1625_v45, %v651_v60  ;;  %v823_v7 = vmul.f32 %v1625_v45, %v691_v61  ;;  %vm742_vm12 = vcmp.gt.f32.partialorder %v651_v60, 0.0  ;;  %vm758_vm13 = vcmp.gt.f32.partialorder %v691_v61, 0.0 }
 0x124   : > { %vm711_vm10 = vcmp.gt.f32.partialorder %v573_v56, 0.0  ;;  %v776_v58 = vmul.f32 %v1625_v45, %v573_v56  ;;  %vm727_vm11 = vcmp.gt.f32.partialorder %v613_v57, 0.0  ;;  %v792_v59 = vmul.f32 %v1625_v45, %v613_v57 }
 0x125   : > { %v871_v12 = vsel %vm742_vm12, %v651_v60, %v807_v6  ;;  %v887_v13 = vsel %vm758_vm13, %v691_v61, %v823_v7 }
 0x126   : > { %v840_v0 = vsel %vm711_vm10, %v573_v56, %v776_v58  ;;  %v856_v1 = vsel %vm727_vm11, %v613_v57, %v792_v59 }
 0x127   : > { %v1322_v2 = vpack.c.bf16 %v840_v0, %v839_v62  ;;  %v1362_v3 = vpack.c.bf16 %v856_v1, %v855_v63 }
 0x128   : > { %v652_v4 = vpop.f32.mrf.mxu2  ;;  %v692_v5 = vpop.f32.mrf.mxu3 }
 0x129   : > { %1450 = vst [vmem:[%s1640_s19 + $0x38] sm:$0xff] %v1322_v2   ;;  %v653_v8 = vadd.f32 %v1621_v42, %v652_v4  ;;  %v693_v9 = vadd.f32 %v1621_v42, %v692_v5 }
 0x12a   : > { %1458 = vst [vmem:[%s1640_s19 + $0x78] sm:$0xff] %v1362_v3  }
 0x12b   : > { %vm743_vm14 = vcmp.gt.f32.partialorder %v653_v8, 0.0  ;;  %v808_v10 = vmul.f32 %v1625_v45, %v653_v8  ;;  %vm759_vm15 = vcmp.gt.f32.partialorder %v693_v9, 0.0  ;;  %v824_v11 = vmul.f32 %v1625_v45, %v693_v9 }
 0x12d   : > { %v872_v14 = vsel %vm743_vm14, %v653_v8, %v808_v10  ;;  %v888_v15 = vsel %vm759_vm15, %v693_v9, %v824_v11 }
 0x12e   : > { %v1402_v16 = vpack.c.bf16 %v872_v14, %v871_v12  ;;  %v1442_v17 = vpack.c.bf16 %v888_v15, %v887_v13 }
 0x130   : > { %1466 = vst [vmem:[%s1640_s19 + $0xb8] sm:$0xff] %v1402_v16  }
 0x131   : > { %1474 = vst [vmem:[%s1640_s19 + $0xf8] sm:$0xff] %v1442_v17  }
 0x132 PF: > { %s15_s17 = sadd.s32 1, %s1514_s17  }
 0x133   : > { %p12_p4 = scmp.ge.s32.totalorder %s15_s17, 4  }
 0x135   :  { %14 = sbr.rel (!%p12_p4) target bundleno = 2 (0x2), region = 66 }

</bundles_post_ra>
